<compile_context>
chip_gen: v7x
topology: tpu7x:2x2x1
jax: 0.10.0
libtpu: 0.0.40
codegen_flags: <defaults>
</compile_context>

<pallas_src>
import jax
import jax.numpy as jnp
from jax.experimental import pallas as pl
from jax.experimental.pallas import tpu as pltpu

# ---- model hyper-parameters (defaults of the PyTorch module) ----
INPUT_SIZE = 8
OUTPUT_SIZE = 4
DENSE = 36                      # dense_layer_size default
NUM_HIDDEN = 4                  # number_of_hidden_layers default

# ---- launch configuration ----
BATCH = 256                     # enough rows to actually use the MXU M dim
TILE_B = 128                    # rows per grid step (2 steps -> 2 TCs on v7x)
PACK_W = 128                    # lane-dense packed-parameter / output width

# ---- packed parameter buffer layout (static row offsets, 8-aligned blocks) ----
W_IN_OFF = 0                                   # [INPUT_SIZE, DENSE]  rows 0..7
B_IN_OFF = 8                                   # [1, DENSE]           row 8
HID_OFF = 16                                   # per-layer block of 48 rows:
HID_STRIDE = 48                                #   +0..+35 weight, +40 bias
HID_B = 40
W_OUT_OFF = HID_OFF + NUM_HIDDEN * HID_STRIDE  # 208: [DENSE, PACK_W]
B_OUT_OFF = W_OUT_OFF + 40                     # 248: [1, PACK_W]
TOTAL_ROWS = B_OUT_OFF + 8                     # 256 rows -> 128 KiB f32 buffer


def dqn_kernel(x_ref, p_ref, o_ref):
    """One batch tile of the whole MLP; all params resident in VMEM."""
    x = x_ref[...]                                            # [TILE_B, IN]

    # input layer + ReLU   (weights stored pre-transposed: [IN, DENSE])
    w = p_ref[W_IN_OFF:W_IN_OFF + INPUT_SIZE, :DENSE]
    b = p_ref[B_IN_OFF:B_IN_OFF + 1, :DENSE]                  # 2-D [1, DENSE]
    h = jnp.dot(x, w, preferred_element_type=jnp.float32)
    h = jnp.maximum(h + b, 0.0)                               # [TILE_B, DENSE]

    # hidden stack (static unroll; all offsets are compile-time constants)
    for l in range(NUM_HIDDEN):
        off = HID_OFF + l * HID_STRIDE
        w = p_ref[off:off + DENSE, :DENSE]                    # [DENSE, DENSE]
        b = p_ref[off + HID_B:off + HID_B + 1, :DENSE]        # [1, DENSE]
        h = jnp.dot(h, w, preferred_element_type=jnp.float32)
        h = jnp.maximum(h + b, 0.0)

    # output layer, lane-dense padded to PACK_W (cols >= OUTPUT_SIZE are zero)
    w = p_ref[W_OUT_OFF:W_OUT_OFF + DENSE, :]                 # [DENSE, PACK_W]
    b = p_ref[B_OUT_OFF:B_OUT_OFF + 1, :]                     # [1, PACK_W]
    y = jnp.dot(h, w, preferred_element_type=jnp.float32)
    o_ref[...] = y + b                                        # [TILE_B, PACK_W]


@jax.jit
def dqn_forward(x, packed_params):
    """x: [B, INPUT_SIZE] f32; packed_params: [TOTAL_ROWS, PACK_W] f32."""
    B = x.shape[0]
    assert B % TILE_B == 0, "batch must be a multiple of TILE_B"
    y_pad = pl.pallas_call(
        dqn_kernel,
        out_shape=jax.ShapeDtypeStruct((B, PACK_W), jnp.float32),
        grid_spec=pltpu.PrefetchScalarGridSpec(
            num_scalar_prefetch=0,
            grid=(B // TILE_B,),
            in_specs=[
                pl.BlockSpec((TILE_B, INPUT_SIZE), lambda i: (i, 0)),
                pl.BlockSpec((TOTAL_ROWS, PACK_W), lambda i: (0, 0)),
            ],
            out_specs=pl.BlockSpec((TILE_B, PACK_W), lambda i: (i, 0)),
        ),
        compiler_params=pltpu.CompilerParams(
            dimension_semantics=("parallel",)),
    )(x, packed_params)
    return y_pad[:, :OUTPUT_SIZE]


def init_params(key):
    """Deterministic init mirroring the nn.Linear shapes ([out, in] weights)."""
    ks = jax.random.split(key, 6)
    scale = 0.1
    w_in = scale * jax.random.normal(ks[0], (DENSE, INPUT_SIZE), jnp.float32)
    b_in = scale * jax.random.normal(ks[1], (DENSE,), jnp.float32)
    w_h = scale * jax.random.normal(ks[2], (NUM_HIDDEN, DENSE, DENSE), jnp.float32)
    b_h = scale * jax.random.normal(ks[3], (NUM_HIDDEN, DENSE), jnp.float32)
    w_out = scale * jax.random.normal(ks[4], (OUTPUT_SIZE, DENSE), jnp.float32)
    b_out = scale * jax.random.normal(ks[5], (OUTPUT_SIZE,), jnp.float32)
    return (w_in, b_in, w_h, b_h, w_out, b_out)


def pack_params(params):
    """Pack PyTorch-layout params into one pre-transposed, lane-dense buffer.

    Done once, outside the hot path (e.g. after every hard_update_model).
    """
    w_in, b_in, w_h, b_h, w_out, b_out = params
    buf = jnp.zeros((TOTAL_ROWS, PACK_W), jnp.float32)
    buf = buf.at[W_IN_OFF:W_IN_OFF + INPUT_SIZE, :DENSE].set(w_in.T)
    buf = buf.at[B_IN_OFF, :DENSE].set(b_in)
    for l in range(NUM_HIDDEN):
        off = HID_OFF + l * HID_STRIDE
        buf = buf.at[off:off + DENSE, :DENSE].set(w_h[l].T)
        buf = buf.at[off + HID_B, :DENSE].set(b_h[l])
    buf = buf.at[W_OUT_OFF:W_OUT_OFF + DENSE, :OUTPUT_SIZE].set(w_out.T)
    buf = buf.at[B_OUT_OFF, :OUTPUT_SIZE].set(b_out)
    return buf


def dqn_forward_ref(x, params):
    """Pure-JAX reference matching the PyTorch forward exactly."""
    w_in, b_in, w_h, b_h, w_out, b_out = params
    h = jnp.maximum(x @ w_in.T + b_in, 0.0)
    for l in range(NUM_HIDDEN):
        h = jnp.maximum(h @ w_h[l].T + b_h[l], 0.0)
    return h @ w_out.T + b_out


# TODO(synk): training-side members of DQN (AdamW optimizer, MSE loss,
# experience buffer, optimize_model/get_loss) are host-side logic, not part of
# the forward pass, and are intentionally not translated to Pallas.

if __name__ == "__main__":
    key = jax.random.PRNGKey(0)
    k_x, k_p = jax.random.split(key)
    x = jax.random.normal(k_x, (BATCH, INPUT_SIZE), jnp.float32)
    params = init_params(k_p)
    packed = pack_params(params)

    y = dqn_forward(x, packed)
    jax.block_until_ready(y)

    y_ref = dqn_forward_ref(x, params)
    assert y.shape == (BATCH, OUTPUT_SIZE)
    assert jnp.allclose(y, y_ref, atol=1e-4, rtol=1e-4), "mismatch vs reference"

    print("KERNEL_OK")
</pallas_src>

<mosaic_0001>
module attributes {stable_mosaic.version = 11 : i64} {
  func.func @dqn_kernel(%arg0: i32, %arg1: memref<128x8xf32, #tpu.memory_space<vmem>>, %arg2: memref<256x128xf32, #tpu.memory_space<vmem>>, %arg3: memref<128x128xf32, #tpu.memory_space<vmem>>) attributes {dimension_semantics = [#tpu.dimension_semantics<parallel>], iteration_bounds = array<i64: 2>, scalar_prefetch = 0 : i64, scratch_operands = 0 : i64, tpu.core_type = #tpu.core_type<tc>, window_params = [{transform_indices = @transform_0, window_bounds = array<i64: 128, 8>}, {pipeline_mode = #tpu.pipeline_mode<synchronous>, transform_indices = @transform_1, window_bounds = array<i64: 256, 128>}, {transform_indices = @transform_2, window_bounds = array<i64: 128, 128>}]} {
    %c0 = arith.constant 0 : index
    %c0_0 = arith.constant 0 : index
    %0 = vector.load %arg1[%c0, %c0_0] : memref<128x8xf32, #tpu.memory_space<vmem>>, vector<128x8xf32>
    %c0_1 = arith.constant 0 : index
    %c0_2 = arith.constant 0 : index
    %1 = vector.load %arg2[%c0_1, %c0_2] : memref<256x128xf32, #tpu.memory_space<vmem>>, vector<8x36xf32>
    %c8 = arith.constant 8 : index
    %c0_3 = arith.constant 0 : index
    %2 = vector.load %arg2[%c8, %c0_3] : memref<256x128xf32, #tpu.memory_space<vmem>>, vector<1x36xf32>
    %cst = arith.constant dense<0.000000e+00> : vector<128x36xf32>
    %3 = tpu.matmul %0, %1, %cst {dimension_numbers = #tpu.dot_dimension_numbers<[1], [0], [0], [1], [0, 0, 1, 1], [], []>} : vector<128x8xf32>, vector<8x36xf32>, vector<128x36xf32> -> vector<128x36xf32>
    %4 = vector.broadcast %2 : vector<1x36xf32> to vector<128x36xf32>
    %5 = arith.addf %3, %4 : vector<128x36xf32>
    %cst_4 = arith.constant 0.000000e+00 : f32
    %6 = vector.broadcast %cst_4 : f32 to vector<128x36xf32>
    %7 = arith.maximumf %5, %6 : vector<128x36xf32>
    %c16 = arith.constant 16 : index
    %c0_5 = arith.constant 0 : index
    %8 = vector.load %arg2[%c16, %c0_5] : memref<256x128xf32, #tpu.memory_space<vmem>>, vector<36x36xf32>
    %c56 = arith.constant 56 : index
    %c0_6 = arith.constant 0 : index
    %9 = vector.load %arg2[%c56, %c0_6] : memref<256x128xf32, #tpu.memory_space<vmem>>, vector<1x36xf32>
    %cst_7 = arith.constant dense<0.000000e+00> : vector<128x36xf32>
    %10 = tpu.matmul %7, %8, %cst_7 {dimension_numbers = #tpu.dot_dimension_numbers<[1], [0], [0], [1], [0, 0, 1, 1], [], []>} : vector<128x36xf32>, vector<36x36xf32>, vector<128x36xf32> -> vector<128x36xf32>
    %11 = vector.broadcast %9 : vector<1x36xf32> to vector<128x36xf32>
    %12 = arith.addf %10, %11 : vector<128x36xf32>
    %cst_8 = arith.constant 0.000000e+00 : f32
    %13 = vector.broadcast %cst_8 : f32 to vector<128x36xf32>
    %14 = arith.maximumf %12, %13 : vector<128x36xf32>
    %c64 = arith.constant 64 : index
    %c0_9 = arith.constant 0 : index
    %15 = vector.load %arg2[%c64, %c0_9] : memref<256x128xf32, #tpu.memory_space<vmem>>, vector<36x36xf32>
    %c104 = arith.constant 104 : index
    %c0_10 = arith.constant 0 : index
    %16 = vector.load %arg2[%c104, %c0_10] : memref<256x128xf32, #tpu.memory_space<vmem>>, vector<1x36xf32>
    %cst_11 = arith.constant dense<0.000000e+00> : vector<128x36xf32>
    %17 = tpu.matmul %14, %15, %cst_11 {dimension_numbers = #tpu.dot_dimension_numbers<[1], [0], [0], [1], [0, 0, 1, 1], [], []>} : vector<128x36xf32>, vector<36x36xf32>, vector<128x36xf32> -> vector<128x36xf32>
    %18 = vector.broadcast %16 : vector<1x36xf32> to vector<128x36xf32>
    %19 = arith.addf %17, %18 : vector<128x36xf32>
    %cst_12 = arith.constant 0.000000e+00 : f32
    %20 = vector.broadcast %cst_12 : f32 to vector<128x36xf32>
    %21 = arith.maximumf %19, %20 : vector<128x36xf32>
    %c112 = arith.constant 112 : index
    %c0_13 = arith.constant 0 : index
    %22 = vector.load %arg2[%c112, %c0_13] : memref<256x128xf32, #tpu.memory_space<vmem>>, vector<36x36xf32>
    %c152 = arith.constant 152 : index
    %c0_14 = arith.constant 0 : index
    %23 = vector.load %arg2[%c152, %c0_14] : memref<256x128xf32, #tpu.memory_space<vmem>>, vector<1x36xf32>
    %cst_15 = arith.constant dense<0.000000e+00> : vector<128x36xf32>
    %24 = tpu.matmul %21, %22, %cst_15 {dimension_numbers = #tpu.dot_dimension_numbers<[1], [0], [0], [1], [0, 0, 1, 1], [], []>} : vector<128x36xf32>, vector<36x36xf32>, vector<128x36xf32> -> vector<128x36xf32>
    %25 = vector.broadcast %23 : vector<1x36xf32> to vector<128x36xf32>
    %26 = arith.addf %24, %25 : vector<128x36xf32>
    %cst_16 = arith.constant 0.000000e+00 : f32
    %27 = vector.broadcast %cst_16 : f32 to vector<128x36xf32>
    %28 = arith.maximumf %26, %27 : vector<128x36xf32>
    %c160 = arith.constant 160 : index
    %c0_17 = arith.constant 0 : index
    %29 = vector.load %arg2[%c160, %c0_17] : memref<256x128xf32, #tpu.memory_space<vmem>>, vector<36x36xf32>
    %c200 = arith.constant 200 : index
    %c0_18 = arith.constant 0 : index
    %30 = vector.load %arg2[%c200, %c0_18] : memref<256x128xf32, #tpu.memory_space<vmem>>, vector<1x36xf32>
    %cst_19 = arith.constant dense<0.000000e+00> : vector<128x36xf32>
    %31 = tpu.matmul %28, %29, %cst_19 {dimension_numbers = #tpu.dot_dimension_numbers<[1], [0], [0], [1], [0, 0, 1, 1], [], []>} : vector<128x36xf32>, vector<36x36xf32>, vector<128x36xf32> -> vector<128x36xf32>
    %32 = vector.broadcast %30 : vector<1x36xf32> to vector<128x36xf32>
    %33 = arith.addf %31, %32 : vector<128x36xf32>
    %cst_20 = arith.constant 0.000000e+00 : f32
    %34 = vector.broadcast %cst_20 : f32 to vector<128x36xf32>
    %35 = arith.maximumf %33, %34 : vector<128x36xf32>
    %c208 = arith.constant 208 : index
    %c0_21 = arith.constant 0 : index
    %36 = vector.load %arg2[%c208, %c0_21] : memref<256x128xf32, #tpu.memory_space<vmem>>, vector<36x128xf32>
    %c248 = arith.constant 248 : index
    %c0_22 = arith.constant 0 : index
    %37 = vector.load %arg2[%c248, %c0_22] : memref<256x128xf32, #tpu.memory_space<vmem>>, vector<1x128xf32>
    %cst_23 = arith.constant dense<0.000000e+00> : vector<128x128xf32>
    %38 = tpu.matmul %35, %36, %cst_23 {dimension_numbers = #tpu.dot_dimension_numbers<[1], [0], [0], [1], [0, 0, 1, 1], [], []>} : vector<128x36xf32>, vector<36x128xf32>, vector<128x128xf32> -> vector<128x128xf32>
    %39 = vector.broadcast %37 : vector<1x128xf32> to vector<128x128xf32>
    %40 = arith.addf %38, %39 : vector<128x128xf32>
    %c0_24 = arith.constant 0 : index
    %c0_25 = arith.constant 0 : index
    %41 = vector.load %arg3[%c0_24, %c0_25] : memref<128x128xf32, #tpu.memory_space<vmem>>, vector<128x128xf32>
    tpu.vector_store %arg3[%c0_24, %c0_25], %40 {strides = array<i32>} : memref<128x128xf32, #tpu.memory_space<vmem>>, vector<128x128xf32>,
    return
  }
  func.func @transform_0(%arg0: i32) -> (i32, i32) {
    %c0_i32 = arith.constant 0 : i32
    %c0_i32_0 = arith.constant 0 : i32
    return %arg0, %c0_i32 : i32, i32
  }
  func.func @transform_1(%arg0: i32) -> (i32, i32) {
    %c0_i32 = arith.constant 0 : i32
    %c0_i32_0 = arith.constant 0 : i32
    %c0_i32_1 = arith.constant 0 : i32
    return %c0_i32, %c0_i32_0 : i32, i32
  }
  func.func @transform_2(%arg0: i32) -> (i32, i32) {
    %c0_i32 = arith.constant 0 : i32
    %c0_i32_0 = arith.constant 0 : i32
    return %arg0, %c0_i32 : i32, i32
  }
}

</mosaic_0001>

<bundles_post_ra>
// kernel: dqn_forward.1
= control target key start
LH: loop header
LB: loop body
LE: loop exit
PB: predicated region body
PF: predicated region fallthrough
CT: control target
= control target key end

     0   :  { %s2060_s9 = smov 0   ;;  %s2324_s0 = inlined_call_operand.vmem [shape: f32[256,8], index: 0, kind: input, shape index: {}]   ;;  %s2325_s1 = inlined_call_operand.vmem [shape: f32[256,128], index: 1, kind: input, shape index: {}]   ;;  %s2326_s2 = inlined_call_operand.vmem [shape: f32[256,128], index: 2, kind: output, shape index: {}]  }
   0x1 LB: > { %s1547_s10 = sadd.s32 4294967295, %s2043_s9   ;;  %p1551_p0 = scmp.ge.s32.totalorder %s2043_s9, 1  ;;  %s2043_s9 = sphi %s2060_s9, %s12_s9  }
   0x2   : > { %p113_p1 = scmp.lt.s32.totalorder %s2043_s9, 3 }
   0x4   : > { %p114_p2 = pnand %p1551_p0, %p113_p1 }
   0x5   : > { %v163_v0 = vld [vmem:[%s2325_s1] sm:$0xff] (!%p114_p2)  ;;  %s1552_s13 = sshll.u32 (!%p114_p2), %s1547_s10, 4  ;;  %v379_v1 = vld [vmem:[%s2325_s1 + $0x10] sm:$0xff] (!%p114_p2)  ;;  %v380_v2 = vld [vmem:[%s2325_s1 + $0x18] sm:$0xff] (!%p114_p2)  ;;  %vm169_vm0 = vcmask (!%p114_p2), 64512   ;;  %vm438_vm1 = vcmask (!%p114_p2), 1043456  }
   0x6   : > { %117 = sbr.rel (%p114_p2) target bundleno = 1352 (0x548), region = 28  ;;  %1787 = vmatprep.subr.mxu0 (!%p114_p2), %v163_v0  ;;  %p136_p3 = scmp.lt.s32.totalorder (!%p114_p2), %s1552_s13, 31  ;;  %v1983_v3 = vpack.c.bf16 (!%p114_p2), %v380_v2, %v379_v1  ;;  %v381_v20 = vld [vmem:[%s2325_s1 + $0x20] sm:$0xff] (!%p114_p2)  ;;  %v382_v21 = vld [vmem:[%s2325_s1 + $0x28] sm:$0xff] (!%p114_p2)  ;;  %v383_v23 = vld [vmem:[%s2325_s1 + $0x30] sm:$0xf] (!%p114_p2) }
   0x7   : > { %1788 = vmatpush3.msra.mxu0 (!%p114_p2), %v163_v0  ;;  %v1987_v22 = vpack.c.bf16 (!%p114_p2), %v382_v21, %v381_v20  ;;  %v603_v24 = vld [vmem:[%s2325_s1 + $0x40] sm:$0xff] (!%p114_p2)  ;;  %v604_v25 = vld [vmem:[%s2325_s1 + $0x48] sm:$0xff] (!%p114_p2)  ;;  %v605_v26 = vld [vmem:[%s2325_s1 + $0x50] sm:$0xff] (!%p114_p2)  ;;  %vm389_vm2 = vcmask (!%p114_p2), 293888  }
   0x8   : > { %1984 = vmatprep.subr.bf16.mxu1 (!%p114_p2), %v1983_v3  ;;  %v1991_v27 = vpack.c.bf16 (!%p114_p2), %v604_v25, %v603_v24  ;;  %v606_v28 = vld [vmem:[%s2325_s1 + $0x58] sm:$0xff] (!%p114_p2)  ;;  %v607_v30 = vld [vmem:[%s2325_s1 + $0x60] sm:$0xf] (!%p114_p2)  ;;  %v1556_v31 = vld [vmem:[%s2325_s1 + $0x8] ss:$0 sm:$0xff] (!%p114_p2) }
   0x9   : > { %1986 = vmatpush3.bf16.msra.mxu1 (!%p114_p2), %v1983_v3  ;;  %v1995_v29 = vpack.c.bf16 (!%p114_p2), %v606_v28, %v605_v26  ;;  %v828_v20 = vld [vmem:[%s2325_s1 + $0x88] sm:$0xff] (!%p114_p2) }
   0xa   : > { %1988 = vmatprep.subr.bf16.mxu1 (!%p114_p2), %v1987_v22  ;;  %1992 = vmatprep.subr.bf16.mxu0 (!%p114_p2), %v1991_v27 }
   0xd   : > { %s2328_s13 = smov (!%p136_p3, %s1552_s13), 31  ;;  %1990 = vmatpush3.bf16.msra.mxu1 %v1987_v22  ;;  %v829_v22 = vld [vmem:[%s2325_s1 + $0x90] sm:$0xf] }
   0xe   : > { %s1553_s18 = sshll.u32 %s2328_s13, 3  ;;  %1821 = vmatprep.subr.msk.mxu1 %vm438_vm1, %v383_v23 }
   0xf   : > { %s2085_s21 = scalar_lea.vmem %s2324_s0, %s1553_s18  ;;  %s2303_s4 = scalar_lea.vmem %s2326_s2, %s1553_s18 }
  0x10   : > { %v147_v4 = vld [vmem:[%s2085_s21] sm:$0xff]  ;;  %v148_v5 = vld [vmem:[%s2085_s21 + $0x8] sm:$0xff]  ;;  %v149_v6 = vld [vmem:[%s2085_s21 + $0x10] sm:$0xff] }
  0x11   : > { %1789 = vmatprep.mubr.msk.f32.mxu0 %vm169_vm0, %v147_v4  ;;  %v150_v7 = vld [vmem:[%s2085_s21 + $0x18] sm:$0xff]  ;;  %v151_v8 = vld [vmem:[%s2085_s21 + $0x20] sm:$0xff]  ;;  %v152_v9 = vld [vmem:[%s2085_s21 + $0x28] sm:$0xff]  ;;  %1822 = vmatpush3.msk.msra.mxu1 %vm438_vm1, %v383_v23 }
  0x12   : > { %1790 = vmatmul.mubr.msk.f32.vlgmr.msra.gmra.mrb[0].mxu0 %vm169_vm0, %v148_v5  ;;  %v153_v10 = vld [vmem:[%s2085_s21 + $0x30] sm:$0xff]  ;;  %v154_v11 = vld [vmem:[%s2085_s21 + $0x38] sm:$0xff]  ;;  %v155_v12 = vld [vmem:[%s2085_s21 + $0x40] sm:$0xff] }
  0x13   : > { %1792 = vmatprep.mubr.msk.f32.mxu0 %vm169_vm0, %v149_v6  ;;  %v156_v13 = vld [vmem:[%s2085_s21 + $0x48] sm:$0xff]  ;;  %v157_v14 = vld [vmem:[%s2085_s21 + $0x50] sm:$0xff]  ;;  %v158_v15 = vld [vmem:[%s2085_s21 + $0x58] sm:$0xff]  ;;  %1994 = vmatpush3.bf16.msra.mxu0 %v1991_v27 }
  0x14   : > { %v159_v16 = vld [vmem:[%s2085_s21 + $0x60] sm:$0xff]  ;;  %v160_v17 = vld [vmem:[%s2085_s21 + $0x68] sm:$0xff]  ;;  %v161_v18 = vld [vmem:[%s2085_s21 + $0x70] sm:$0xff]  ;;  %1996 = vmatprep.subr.bf16.mxu0 %v1995_v29 }
  0x15   : > { %v162_v19 = vld [vmem:[%s2085_s21 + $0x78] sm:$0xff] }
  0x16   : > { %1793 = vmatmul.mubr.msk.f32.gmra.mrb[2].mxu0 %vm169_vm0, %v150_v7  ;;  %v1573_v23 = vld [vmem:[%s2325_s1 + $0x38] ss:$0 sm:$0xff] }
  0x17   : > { %1795 = vmatprep.mubr.msk.f32.mxu0 %vm169_vm0, %v151_v8  ;;  %1998 = vmatpush3.bf16.msra.mxu0 %v1995_v29 }
  0x18   : > { %1855 = vmatprep.subr.msk.mxu0 %vm438_vm1, %v607_v30 }
  0x1a   : > { %1796 = vmatmul.mubr.msk.f32.gmra.mrb[4].mxu0 %vm169_vm0, %v152_v9 }
  0x1b   : > { %1798 = vmatprep.mubr.msk.f32.mxu0 %vm169_vm0, %v153_v10  ;;  %1856 = vmatpush3.msk.msra.mxu0 %vm438_vm1, %v607_v30 }
  0x1e   : > { %1799 = vmatmul.mubr.msk.f32.gmra.mrb[6].mxu0 %vm169_vm0, %v154_v11 }
  0x1f   : > { %1801 = vmatprep.mubr.msk.f32.mxu0 %vm169_vm0, %v155_v12 }
  0x22   : > { %1802 = vmatmul.mubr.msk.f32.gmra.mrb[8].mxu0 %vm169_vm0, %v156_v13 }
  0x23   : > { %1804 = vmatprep.mubr.msk.f32.mxu0 %vm169_vm0, %v157_v14 }
  0x26   : > { %1805 = vmatmul.mubr.msk.f32.gmra.mrb[10].mxu0 %vm169_vm0, %v158_v15 }
  0x27   : > { %1807 = vmatprep.mubr.msk.f32.mxu0 %vm169_vm0, %v159_v16  ;;  %v825_v16 = vld [vmem:[%s2325_s1 + $0x70] sm:$0xff] }
  0x2a   : > { %1808 = vmatmul.mubr.msk.f32.gmra.mrb[12].mxu0 %vm169_vm0, %v160_v17  ;;  %v826_v17 = vld [vmem:[%s2325_s1 + $0x78] sm:$0xff] }
  0x2b   : > { %1810 = vmatprep.mubr.msk.f32.mxu0 %vm169_vm0, %v161_v18  ;;  %v827_v18 = vld [vmem:[%s2325_s1 + $0x80] sm:$0xff] }
  0x2c   : > { %v2003_v21 = vpack.c.bf16 %v828_v20, %v827_v18 }
  0x2e   : > { %1811 = vmatmul.mubr.msk.f32.gmra.mrb[14].mxu0 %vm169_vm0, %v162_v19  ;;  %v1999_v19 = vpack.c.bf16 %v826_v17, %v825_v16 }
  0x30   : > { %2000 = vmatprep.subr.bf16.mxu1 %v1999_v19 }
  0xe5   : > { %v1791_v32 = vpop.f32.mrb[0].mxu0 }
  0xe6   : > { %v290_v33 = vadd.f32 %v1791_v32, %v1556_v31  ;;  %v284_v34 = vpop.f32.mrb[1].mxu0 }
  0xe7   : > { %v285_v35 = vadd.f32 %v1556_v31, %v284_v34 }
  0xe8   : > { %v364_v38 = vmax.f32 %v290_v33, 0.0 }
  0xe9   : > { %v363_v36 = vmax.f32 %v285_v35, 0.0  ;;  %v1794_v37 = vpop.f32.mrb[2].mxu0 }
  0xea   : > { %v300_v39 = vadd.f32 %v1794_v37, %v1556_v31  ;;  %v294_v40 = vpop.f32.mrb[3].mxu0 }
  0xeb   : > { %v295_v41 = vadd.f32 %v1556_v31, %v294_v40  ;;  %1823 = vmatprep.mubr.msk.f32.mxu1 %vm389_vm2, %v363_v36 }
  0xec   : > { %1824 = vmatmul.mubr.msk.f32.vlgmr.msra.gmra.mrb[0].mxu1 %vm389_vm2, %v364_v38  ;;  %v366_v44 = vmax.f32 %v300_v39, 0.0 }
  0xed   : > { %v365_v42 = vmax.f32 %v295_v41, 0.0  ;;  %v1797_v43 = vpop.f32.mrb[4].mxu0  ;;  %2002 = vmatpush3.bf16.msra.mxu1 %v1999_v19 }
  0xee   : > { %v310_v45 = vadd.f32 %v1797_v43, %v1556_v31  ;;  %v304_v46 = vpop.f32.mrb[5].mxu0  ;;  %2004 = vmatprep.subr.bf16.mxu1 %v2003_v21 }
  0xef   : > { %v305_v47 = vadd.f32 %v1556_v31, %v304_v46  ;;  %1826 = vmatprep.mubr.msk.f32.mxu1 %vm389_vm2, %v365_v42 }
  0xf0   : > { %1827 = vmatmul.mubr.msk.f32.gmra.mrb[2].mxu1 %vm389_vm2, %v366_v44  ;;  %v368_v50 = vmax.f32 %v310_v45, 0.0 }
  0xf1   : > { %v367_v48 = vmax.f32 %v305_v47, 0.0  ;;  %v1800_v49 = vpop.f32.mrb[6].mxu0  ;;  %2006 = vmatpush3.bf16.msra.mxu1 %v2003_v21 }
  0xf2   : > { %v320_v51 = vadd.f32 %v1800_v49, %v1556_v31  ;;  %v314_v52 = vpop.f32.mrb[7].mxu0  ;;  %1889 = vmatprep.subr.msk.mxu1 %vm438_vm1, %v829_v22 }
  0xf3   : > { %v315_v53 = vadd.f32 %v1556_v31, %v314_v52  ;;  %1829 = vmatprep.mubr.msk.f32.mxu1 %vm389_vm2, %v367_v48 }
  0xf4   : > { %1830 = vmatmul.mubr.msk.f32.gmra.mrb[4].mxu1 %vm389_vm2, %v368_v50  ;;  %v370_v56 = vmax.f32 %v320_v51, 0.0 }
  0xf5   : > { %v369_v54 = vmax.f32 %v315_v53, 0.0  ;;  %v1803_v55 = vpop.f32.mrb[8].mxu0  ;;  %1890 = vmatpush3.msk.msra.mxu1 %vm438_vm1, %v829_v22 }
  0xf6   : > { %v330_v57 = vadd.f32 %v1803_v55, %v1556_v31  ;;  %v324_v58 = vpop.f32.mrb[9].mxu0 }
  0xf7   : > { %v325_v59 = vadd.f32 %v1556_v31, %v324_v58  ;;  %1832 = vmatprep.mubr.msk.f32.mxu1 %vm389_vm2, %v369_v54 }
  0xf8   : > { %1833 = vmatmul.mubr.msk.f32.gmra.mrb[6].mxu1 %vm389_vm2, %v370_v56  ;;  %v372_v62 = vmax.f32 %v330_v57, 0.0 }
  0xf9   : > { %v371_v60 = vmax.f32 %v325_v59, 0.0  ;;  %v1806_v61 = vpop.f32.mrb[10].mxu0 }
  0xfa   : > { %v340_v63 = vadd.f32 %v1806_v61, %v1556_v31  ;;  %v334_v0 = vpop.f32.mrb[11].mxu0 }
  0xfb   : > { %v335_v1 = vadd.f32 %v1556_v31, %v334_v0  ;;  %1835 = vmatprep.mubr.msk.f32.mxu1 %vm389_vm2, %v371_v60 }
  0xfc   : > { %1836 = vmatmul.mubr.msk.f32.gmra.mrb[8].mxu1 %vm389_vm2, %v372_v62  ;;  %v374_v4 = vmax.f32 %v340_v63, 0.0 }
  0xfd   : > { %v373_v2 = vmax.f32 %v335_v1, 0.0  ;;  %v1809_v3 = vpop.f32.mrb[12].mxu0 }
  0xfe   : > { %v350_v5 = vadd.f32 %v1809_v3, %v1556_v31  ;;  %v344_v6 = vpop.f32.mrb[13].mxu0 }
  0xff   : > { %v345_v7 = vadd.f32 %v1556_v31, %v344_v6  ;;  %1838 = vmatprep.mubr.msk.f32.mxu1 %vm389_vm2, %v373_v2 }
 0x100   : > { %1839 = vmatmul.mubr.msk.f32.gmra.mrb[10].mxu1 %vm389_vm2, %v374_v4  ;;  %v376_v10 = vmax.f32 %v350_v5, 0.0 }
 0x101   : > { %v375_v8 = vmax.f32 %v345_v7, 0.0  ;;  %v1812_v9 = vpop.f32.mrb[14].mxu0 }
 0x102   : > { %v360_v11 = vadd.f32 %v1812_v9, %v1556_v31  ;;  %v354_v12 = vpop.f32.mrb[15].mxu0  ;;  %v1048_v9 = vld [vmem:[%s2325_s1 + $0xa8] sm:$0xff] }
 0x103   : > { %v355_v13 = vadd.f32 %v1556_v31, %v354_v12  ;;  %1841 = vmatprep.mubr.msk.f32.mxu1 %vm389_vm2, %v375_v8  ;;  %v1047_v8 = vld [vmem:[%s2325_s1 + $0xa0] sm:$0xff]  ;;  %v1050_v12 = vld [vmem:[%s2325_s1 + $0xb8] sm:$0xff] }
 0x104   : > { %1842 = vmatmul.mubr.msk.f32.gmra.mrb[12].mxu1 %vm389_vm2, %v376_v10  ;;  %v378_v15 = vmax.f32 %v360_v11, 0.0  ;;  %v1049_v10 = vld [vmem:[%s2325_s1 + $0xb0] sm:$0xff]  ;;  %v2007_v11 = vpack.c.bf16 %v1048_v9, %v1047_v8 }
 0x105   : > { %v377_v14 = vmax.f32 %v355_v13, 0.0  ;;  %v2011_v13 = vpack.c.bf16 %v1050_v12, %v1049_v10 }
 0x106   : > { %2008 = vmatprep.subr.bf16.mxu0 %v2007_v11 }
 0x107   : > { %1844 = vmatprep.mubr.msk.f32.mxu1 %vm389_vm2, %v377_v14  ;;  %v1051_v14 = vld [vmem:[%s2325_s1 + $0xc0] sm:$0xf] }
 0x108   : > { %1845 = vmatmul.mubr.msk.f32.gmra.mrb[14].mxu1 %vm389_vm2, %v378_v15  ;;  %v1591_v15 = vld [vmem:[%s2325_s1 + $0x68] ss:$0 sm:$0xff] }
 0x1bf   : > { %v1825_v24 = vpop.f32.mrb[0].mxu1 }
 0x1c0   : > { %v514_v25 = vadd.f32 %v1825_v24, %v1573_v23  ;;  %v508_v26 = vpop.f32.mrb[1].mxu1 }
 0x1c1   : > { %v509_v27 = vadd.f32 %v1573_v23, %v508_v26 }
 0x1c2   : > { %v588_v30 = vmax.f32 %v514_v25, 0.0 }
 0x1c3   : > { %v587_v28 = vmax.f32 %v509_v27, 0.0  ;;  %v1828_v29 = vpop.f32.mrb[2].mxu1 }
 0x1c4   : > { %v524_v31 = vadd.f32 %v1828_v29, %v1573_v23  ;;  %v518_v32 = vpop.f32.mrb[3].mxu1 }
 0x1c5   : > { %v519_v33 = vadd.f32 %v1573_v23, %v518_v32  ;;  %1857 = vmatprep.mubr.msk.f32.mxu0 %vm389_vm2, %v587_v28 }
 0x1c6   : > { %1858 = vmatmul.mubr.msk.f32.vlgmr.msra.gmra.mrb[16].mxu0 %vm389_vm2, %v588_v30  ;;  %v590_v36 = vmax.f32 %v524_v31, 0.0 }
 0x1c7   : > { %v589_v34 = vmax.f32 %v519_v33, 0.0  ;;  %v1831_v35 = vpop.f32.mrb[4].mxu1  ;;  %2010 = vmatpush3.bf16.msra.mxu0 %v2007_v11 }
 0x1c8   : > { %v534_v37 = vadd.f32 %v1831_v35, %v1573_v23  ;;  %v528_v38 = vpop.f32.mrb[5].mxu1  ;;  %2012 = vmatprep.subr.bf16.mxu0 %v2011_v13 }
 0x1c9   : > { %v529_v39 = vadd.f32 %v1573_v23, %v528_v38  ;;  %1860 = vmatprep.mubr.msk.f32.mxu0 %vm389_vm2, %v589_v34 }
 0x1ca   : > { %1861 = vmatmul.mubr.msk.f32.gmra.mrb[18].mxu0 %vm389_vm2, %v590_v36  ;;  %v592_v42 = vmax.f32 %v534_v37, 0.0 }
 0x1cb   : > { %v591_v40 = vmax.f32 %v529_v39, 0.0  ;;  %v1834_v41 = vpop.f32.mrb[6].mxu1  ;;  %2014 = vmatpush3.bf16.msra.mxu0 %v2011_v13 }
 0x1cc   : > { %v544_v43 = vadd.f32 %v1834_v41, %v1573_v23  ;;  %v538_v44 = vpop.f32.mrb[7].mxu1  ;;  %1923 = vmatprep.subr.msk.mxu0 %vm438_vm1, %v1051_v14 }
 0x1cd   : > { %v539_v45 = vadd.f32 %v1573_v23, %v538_v44  ;;  %1863 = vmatprep.mubr.msk.f32.mxu0 %vm389_vm2, %v591_v40 }
 0x1ce   : > { %1864 = vmatmul.mubr.msk.f32.gmra.mrb[20].mxu0 %vm389_vm2, %v592_v42  ;;  %v594_v48 = vmax.f32 %v544_v43, 0.0 }
 0x1cf   : > { %v593_v46 = vmax.f32 %v539_v45, 0.0  ;;  %v1837_v47 = vpop.f32.mrb[8].mxu1  ;;  %1924 = vmatpush3.msk.msra.mxu0 %vm438_vm1, %v1051_v14 }
 0x1d0   : > { %v554_v49 = vadd.f32 %v1837_v47, %v1573_v23  ;;  %v548_v50 = vpop.f32.mrb[9].mxu1 }
 0x1d1   : > { %v549_v51 = vadd.f32 %v1573_v23, %v548_v50  ;;  %1866 = vmatprep.mubr.msk.f32.mxu0 %vm389_vm2, %v593_v46 }
 0x1d2   : > { %1867 = vmatmul.mubr.msk.f32.gmra.mrb[22].mxu0 %vm389_vm2, %v594_v48  ;;  %v596_v54 = vmax.f32 %v554_v49, 0.0 }
 0x1d3   : > { %v595_v52 = vmax.f32 %v549_v51, 0.0  ;;  %v1840_v53 = vpop.f32.mrb[10].mxu1 }
 0x1d4   : > { %v564_v55 = vadd.f32 %v1840_v53, %v1573_v23  ;;  %v558_v56 = vpop.f32.mrb[11].mxu1 }
 0x1d5   : > { %v559_v57 = vadd.f32 %v1573_v23, %v558_v56  ;;  %1869 = vmatprep.mubr.msk.f32.mxu0 %vm389_vm2, %v595_v52 }
 0x1d6   : > { %1870 = vmatmul.mubr.msk.f32.gmra.mrb[24].mxu0 %vm389_vm2, %v596_v54  ;;  %v598_v60 = vmax.f32 %v564_v55, 0.0 }
 0x1d7   : > { %v597_v58 = vmax.f32 %v559_v57, 0.0  ;;  %v1843_v59 = vpop.f32.mrb[12].mxu1 }
 0x1d8   : > { %v574_v61 = vadd.f32 %v1843_v59, %v1573_v23  ;;  %v568_v62 = vpop.f32.mrb[13].mxu1 }
 0x1d9   : > { %v569_v63 = vadd.f32 %v1573_v23, %v568_v62  ;;  %1872 = vmatprep.mubr.msk.f32.mxu0 %vm389_vm2, %v597_v58 }
 0x1da   : > { %1873 = vmatmul.mubr.msk.f32.gmra.mrb[26].mxu0 %vm389_vm2, %v598_v60  ;;  %v600_v2 = vmax.f32 %v574_v61, 0.0 }
 0x1db   : > { %v599_v0 = vmax.f32 %v569_v63, 0.0  ;;  %v1846_v1 = vpop.f32.mrb[14].mxu1 }
 0x1dc   : > { %v584_v3 = vadd.f32 %v1846_v1, %v1573_v23  ;;  %v578_v4 = vpop.f32.mrb[15].mxu1  ;;  %v1270_v1 = vld [vmem:[%s2325_s1 + $0xd8] sm:$0xff] }
 0x1dd   : > { %v579_v5 = vadd.f32 %v1573_v23, %v578_v4  ;;  %1875 = vmatprep.mubr.msk.f32.mxu0 %vm389_vm2, %v599_v0  ;;  %v1269_v0 = vld [vmem:[%s2325_s1 + $0xd0] sm:$0xff]  ;;  %v1272_v4 = vld [vmem:[%s2325_s1 + $0xe8] sm:$0xff] }
 0x1de   : > { %1876 = vmatmul.mubr.msk.f32.gmra.mrb[28].mxu0 %vm389_vm2, %v600_v2  ;;  %v602_v7 = vmax.f32 %v584_v3, 0.0  ;;  %v1271_v2 = vld [vmem:[%s2325_s1 + $0xe0] sm:$0xff]  ;;  %v2015_v3 = vpack.c.bf16 %v1270_v1, %v1269_v0 }
 0x1df   : > { %v601_v6 = vmax.f32 %v579_v5, 0.0  ;;  %v2019_v5 = vpack.c.bf16 %v1272_v4, %v1271_v2 }
 0x1e0   : > { %2023 = vmatprep.subr.bf16.mxu1 %v2015_v3  ;;  %2016 = vmatprep.subr.bf16.mxu0 %v2015_v3 }
 0x1e1   : > { %1878 = vmatprep.mubr.msk.f32.mxu0 %vm389_vm2, %v601_v6  ;;  %v1609_v6 = vld [vmem:[%s2325_s1 + $0x98] ss:$0 sm:$0xff] }
 0x1e2   : > { %1879 = vmatmul.mubr.msk.f32.gmra.mrb[30].mxu0 %vm389_vm2, %v602_v7 }
 0x299   : > { %v1859_v16 = vpop.f32.mrb[16].mxu0 }
 0x29a   : > { %v736_v17 = vadd.f32 %v1859_v16, %v1591_v15  ;;  %v730_v18 = vpop.f32.mrb[17].mxu0 }
 0x29b   : > { %v731_v19 = vadd.f32 %v1591_v15, %v730_v18 }
 0x29c   : > { %v810_v22 = vmax.f32 %v736_v17, 0.0 }
 0x29d   : > { %v809_v20 = vmax.f32 %v731_v19, 0.0  ;;  %v1862_v21 = vpop.f32.mrb[18].mxu0 }
 0x29e   : > { %v746_v23 = vadd.f32 %v1862_v21, %v1591_v15  ;;  %v740_v24 = vpop.f32.mrb[19].mxu0 }
 0x29f   : > { %v741_v25 = vadd.f32 %v1591_v15, %v740_v24  ;;  %1891 = vmatprep.mubr.msk.f32.mxu1 %vm389_vm2, %v809_v20 }
 0x2a0   : > { %1892 = vmatmul.mubr.msk.f32.vlgmr.msra.gmra.mrb[16].mxu1 %vm389_vm2, %v810_v22  ;;  %v812_v28 = vmax.f32 %v746_v23, 0.0 }
 0x2a1   : > { %v811_v26 = vmax.f32 %v741_v25, 0.0  ;;  %v1865_v27 = vpop.f32.mrb[20].mxu0  ;;  %2026 = vmatpush3.bf16.msra.mxu1 %v2015_v3 }
 0x2a2   : > { %v756_v29 = vadd.f32 %v1865_v27, %v1591_v15  ;;  %v750_v30 = vpop.f32.mrb[21].mxu0  ;;  %2024 = vmatprep.subr.bf16.mxu1 %v2019_v5 }
 0x2a3   : > { %v751_v31 = vadd.f32 %v1591_v15, %v750_v30  ;;  %1894 = vmatprep.mubr.msk.f32.mxu1 %vm389_vm2, %v811_v26 }
 0x2a4   : > { %1895 = vmatmul.mubr.msk.f32.gmra.mrb[18].mxu1 %vm389_vm2, %v812_v28  ;;  %v814_v34 = vmax.f32 %v756_v29, 0.0 }
 0x2a5   : > { %v813_v32 = vmax.f32 %v751_v31, 0.0  ;;  %v1868_v33 = vpop.f32.mrb[22].mxu0  ;;  %2027 = vmatpush3.bf16.msra.mxu1 %v2019_v5 }
 0x2a6   : > { %v766_v35 = vadd.f32 %v1868_v33, %v1591_v15  ;;  %v760_v36 = vpop.f32.mrb[23].mxu0 }
 0x2a7   : > { %v761_v37 = vadd.f32 %v1591_v15, %v760_v36  ;;  %1897 = vmatprep.mubr.msk.f32.mxu1 %vm389_vm2, %v813_v32 }
 0x2a8   : > { %1898 = vmatmul.mubr.msk.f32.gmra.mrb[20].mxu1 %vm389_vm2, %v814_v34  ;;  %v816_v40 = vmax.f32 %v766_v35, 0.0 }
 0x2a9   : > { %v815_v38 = vmax.f32 %v761_v37, 0.0  ;;  %v1871_v39 = vpop.f32.mrb[24].mxu0 }
 0x2aa   : > { %v776_v41 = vadd.f32 %v1871_v39, %v1591_v15  ;;  %v770_v42 = vpop.f32.mrb[25].mxu0 }
 0x2ab   : > { %v771_v43 = vadd.f32 %v1591_v15, %v770_v42  ;;  %1900 = vmatprep.mubr.msk.f32.mxu1 %vm389_vm2, %v815_v38 }
 0x2ac   : > { %1901 = vmatmul.mubr.msk.f32.gmra.mrb[22].mxu1 %vm389_vm2, %v816_v40  ;;  %v818_v46 = vmax.f32 %v776_v41, 0.0 }
 0x2ad   : > { %v817_v44 = vmax.f32 %v771_v43, 0.0  ;;  %v1874_v45 = vpop.f32.mrb[26].mxu0 }
 0x2ae   : > { %v786_v47 = vadd.f32 %v1874_v45, %v1591_v15  ;;  %v780_v48 = vpop.f32.mrb[27].mxu0 }
 0x2af   : > { %v781_v49 = vadd.f32 %v1591_v15, %v780_v48  ;;  %1903 = vmatprep.mubr.msk.f32.mxu1 %vm389_vm2, %v817_v44 }
 0x2b0   : > { %1904 = vmatmul.mubr.msk.f32.gmra.mrb[24].mxu1 %vm389_vm2, %v818_v46  ;;  %v820_v52 = vmax.f32 %v786_v47, 0.0 }
 0x2b1   : > { %v819_v50 = vmax.f32 %v781_v49, 0.0  ;;  %v1877_v51 = vpop.f32.mrb[28].mxu0 }
 0x2b2   : > { %v796_v53 = vadd.f32 %v1877_v51, %v1591_v15  ;;  %v790_v54 = vpop.f32.mrb[29].mxu0 }
 0x2b3   : > { %v791_v55 = vadd.f32 %v1591_v15, %v790_v54  ;;  %1906 = vmatprep.mubr.msk.f32.mxu1 %vm389_vm2, %v819_v50 }
 0x2b4   : > { %1907 = vmatmul.mubr.msk.f32.gmra.mrb[26].mxu1 %vm389_vm2, %v820_v52  ;;  %v822_v58 = vmax.f32 %v796_v53, 0.0 }
 0x2b5   : > { %v821_v56 = vmax.f32 %v791_v55, 0.0  ;;  %v1880_v57 = vpop.f32.mrb[30].mxu0  ;;  %v1273_v55 = vld [vmem:[%s2325_s1 + $0xf0] sm:$0xf] }
 0x2b6   : > { %v806_v59 = vadd.f32 %v1880_v57, %v1591_v15  ;;  %v800_v60 = vpop.f32.mrb[31].mxu0  ;;  %2025 = vmatprep.subr.msk.mxu1 %vm438_vm1, %v1273_v55 }
 0x2b7   : > { %v801_v61 = vadd.f32 %v1591_v15, %v800_v60  ;;  %1909 = vmatprep.mubr.msk.f32.mxu1 %vm389_vm2, %v821_v56  ;;  %2028 = vmatpush3.msk.msra.mxu1 %vm438_vm1, %v1273_v55  ;;  %v1627_v56 = vld [vmem:[%s2325_s1 + $0xc8] ss:$0 sm:$0xff] }
 0x2b8   : > { %1910 = vmatmul.mubr.msk.f32.gmra.mrb[28].mxu1 %vm389_vm2, %v822_v58  ;;  %v824_v63 = vmax.f32 %v806_v59, 0.0 }
 0x2b9   : > { %v823_v62 = vmax.f32 %v801_v61, 0.0 }
 0x2bb   : > { %1912 = vmatprep.mubr.msk.f32.mxu1 %vm389_vm2, %v823_v62 }
 0x2bc   : > { %1913 = vmatmul.mubr.msk.f32.gmra.mrb[30].mxu1 %vm389_vm2, %v824_v63 }
 0x373   : > { %v1893_v7 = vpop.f32.mrb[16].mxu1 }
 0x374   : > { %v958_v8 = vadd.f32 %v1893_v7, %v1609_v6  ;;  %v952_v9 = vpop.f32.mrb[17].mxu1 }
 0x375   : > { %v953_v10 = vadd.f32 %v1609_v6, %v952_v9 }
 0x376   : > { %v1032_v13 = vmax.f32 %v958_v8, 0.0 }
 0x377   : > { %v1031_v11 = vmax.f32 %v953_v10, 0.0  ;;  %v1896_v12 = vpop.f32.mrb[18].mxu1 }
 0x378   : > { %v968_v14 = vadd.f32 %v1896_v12, %v1609_v6  ;;  %v962_v15 = vpop.f32.mrb[19].mxu1 }
 0x379   : > { %v963_v16 = vadd.f32 %v1609_v6, %v962_v15  ;;  %1925 = vmatprep.mubr.msk.f32.mxu0 %vm389_vm2, %v1031_v11 }
 0x37a   : > { %1926 = vmatmul.mubr.msk.f32.vlgmr.msra.gmra.mrb[32].mxu0 %vm389_vm2, %v1032_v13  ;;  %v1034_v19 = vmax.f32 %v968_v14, 0.0 }
 0x37b   : > { %v1033_v17 = vmax.f32 %v963_v16, 0.0  ;;  %v1899_v18 = vpop.f32.mrb[20].mxu1  ;;  %2018 = vmatpush3.bf16.msra.mxu0 %v2015_v3 }
 0x37c   : > { %v978_v20 = vadd.f32 %v1899_v18, %v1609_v6  ;;  %v972_v21 = vpop.f32.mrb[21].mxu1  ;;  %2020 = vmatprep.subr.bf16.mxu0 %v2019_v5 }
 0x37d   : > { %v973_v22 = vadd.f32 %v1609_v6, %v972_v21  ;;  %1928 = vmatprep.mubr.msk.f32.mxu0 %vm389_vm2, %v1033_v17 }
 0x37e   : > { %1929 = vmatmul.mubr.msk.f32.gmra.mrb[34].mxu0 %vm389_vm2, %v1034_v19  ;;  %v1036_v25 = vmax.f32 %v978_v20, 0.0 }
 0x37f   : > { %v1035_v23 = vmax.f32 %v973_v22, 0.0  ;;  %v1902_v24 = vpop.f32.mrb[22].mxu1  ;;  %2022 = vmatpush3.bf16.msra.mxu0 %v2019_v5 }
 0x380   : > { %v988_v26 = vadd.f32 %v1902_v24, %v1609_v6  ;;  %v982_v27 = vpop.f32.mrb[23].mxu1  ;;  %1957 = vmatprep.subr.msk.mxu0 %vm438_vm1, %v1273_v55 }
 0x381   : > { %v983_v28 = vadd.f32 %v1609_v6, %v982_v27  ;;  %1931 = vmatprep.mubr.msk.f32.mxu0 %vm389_vm2, %v1035_v23 }
 0x382   : > { %1932 = vmatmul.mubr.msk.f32.gmra.mrb[36].mxu0 %vm389_vm2, %v1036_v25  ;;  %v1038_v31 = vmax.f32 %v988_v26, 0.0 }
 0x383   : > { %v1037_v29 = vmax.f32 %v983_v28, 0.0  ;;  %v1905_v30 = vpop.f32.mrb[24].mxu1  ;;  %1958 = vmatpush3.msk.msra.mxu0 %vm438_vm1, %v1273_v55 }
 0x384   : > { %v998_v32 = vadd.f32 %v1905_v30, %v1609_v6  ;;  %v992_v33 = vpop.f32.mrb[25].mxu1 }
 0x385   : > { %v993_v34 = vadd.f32 %v1609_v6, %v992_v33  ;;  %1934 = vmatprep.mubr.msk.f32.mxu0 %vm389_vm2, %v1037_v29 }
 0x386   : > { %1935 = vmatmul.mubr.msk.f32.gmra.mrb[38].mxu0 %vm389_vm2, %v1038_v31  ;;  %v1040_v37 = vmax.f32 %v998_v32, 0.0 }
 0x387   : > { %v1039_v35 = vmax.f32 %v993_v34, 0.0  ;;  %v1908_v36 = vpop.f32.mrb[26].mxu1 }
 0x388   : > { %v1008_v38 = vadd.f32 %v1908_v36, %v1609_v6  ;;  %v1002_v39 = vpop.f32.mrb[27].mxu1 }
 0x389   : > { %v1003_v40 = vadd.f32 %v1609_v6, %v1002_v39  ;;  %1937 = vmatprep.mubr.msk.f32.mxu0 %vm389_vm2, %v1039_v35 }
 0x38a   : > { %1938 = vmatmul.mubr.msk.f32.gmra.mrb[40].mxu0 %vm389_vm2, %v1040_v37  ;;  %v1042_v43 = vmax.f32 %v1008_v38, 0.0 }
 0x38b   : > { %v1041_v41 = vmax.f32 %v1003_v40, 0.0  ;;  %v1911_v42 = vpop.f32.mrb[28].mxu1 }
 0x38c   : > { %v1018_v44 = vadd.f32 %v1911_v42, %v1609_v6  ;;  %v1012_v45 = vpop.f32.mrb[29].mxu1 }
 0x38d   : > { %v1013_v46 = vadd.f32 %v1609_v6, %v1012_v45  ;;  %1940 = vmatprep.mubr.msk.f32.mxu0 %vm389_vm2, %v1041_v41  ;;  %v1645_v41 = vld [vmem:[%s2325_s1 + $0xf8] ss:$0 sm:$0xff] }
 0x38e   : > { %1941 = vmatmul.mubr.msk.f32.gmra.mrb[42].mxu0 %vm389_vm2, %v1042_v43  ;;  %v1044_v49 = vmax.f32 %v1018_v44, 0.0 }
 0x38f   : > { %v1043_v47 = vmax.f32 %v1013_v46, 0.0  ;;  %v1914_v48 = vpop.f32.mrb[30].mxu1 }
 0x390   : > { %v1028_v50 = vadd.f32 %v1914_v48, %v1609_v6  ;;  %v1022_v51 = vpop.f32.mrb[31].mxu1 }
 0x391   : > { %v1023_v52 = vadd.f32 %v1609_v6, %v1022_v51  ;;  %1943 = vmatprep.mubr.msk.f32.mxu0 %vm389_vm2, %v1043_v47 }
 0x392   : > { %1944 = vmatmul.mubr.msk.f32.gmra.mrb[44].mxu0 %vm389_vm2, %v1044_v49  ;;  %v1046_v54 = vmax.f32 %v1028_v50, 0.0 }
 0x393   : > { %v1045_v53 = vmax.f32 %v1023_v52, 0.0 }
 0x395   : > { %1946 = vmatprep.mubr.msk.f32.mxu0 %vm389_vm2, %v1045_v53 }
 0x396   : > { %1947 = vmatmul.mubr.msk.f32.gmra.mrb[46].mxu0 %vm389_vm2, %v1046_v54 }
 0x44d   : > { %v1927_v57 = vpop.f32.mrb[32].mxu0 }
 0x44e   : > { %v1180_v58 = vadd.f32 %v1927_v57, %v1627_v56  ;;  %v1174_v59 = vpop.f32.mrb[33].mxu0 }
 0x44f   : > { %v1175_v60 = vadd.f32 %v1627_v56, %v1174_v59 }
 0x450   : > { %v1254_v63 = vmax.f32 %v1180_v58, 0.0 }
 0x451   : > { %v1253_v61 = vmax.f32 %v1175_v60, 0.0  ;;  %v1930_v62 = vpop.f32.mrb[34].mxu0 }
 0x452   : > { %v1190_v0 = vadd.f32 %v1930_v62, %v1627_v56  ;;  %v1184_v1 = vpop.f32.mrb[35].mxu0 }
 0x453   : > { %v1185_v2 = vadd.f32 %v1627_v56, %v1184_v1  ;;  %1959 = vmatprep.mubr.msk.f32.mxu0 %vm389_vm2, %v1253_v61 }
 0x454   : > { %1960 = vmatmul.mubr.msk.f32.vlgmr.msra.gmra.mrb[48].mxu0 %vm389_vm2, %v1254_v63  ;;  %v1256_v5 = vmax.f32 %v1190_v0, 0.0 }
 0x455   : > { %v1255_v3 = vmax.f32 %v1185_v2, 0.0  ;;  %v1933_v4 = vpop.f32.mrb[36].mxu0 }
 0x456   : > { %v1200_v6 = vadd.f32 %v1933_v4, %v1627_v56  ;;  %v1194_v7 = vpop.f32.mrb[37].mxu0 }
 0x457   : > { %v1195_v8 = vadd.f32 %v1627_v56, %v1194_v7  ;;  %1962 = vmatprep.mubr.msk.f32.mxu1 %vm389_vm2, %v1255_v3 }
 0x458   : > { %1963 = vmatmul.mubr.msk.f32.vlgmr.msra.gmra.mrb[32].mxu1 %vm389_vm2, %v1256_v5  ;;  %v1258_v11 = vmax.f32 %v1200_v6, 0.0 }
 0x459   : > { %v1257_v9 = vmax.f32 %v1195_v8, 0.0  ;;  %v1936_v10 = vpop.f32.mrb[38].mxu0 }
 0x45a   : > { %v1210_v12 = vadd.f32 %v1936_v10, %v1627_v56  ;;  %v1204_v13 = vpop.f32.mrb[39].mxu0 }
 0x45b   : > { %v1205_v14 = vadd.f32 %v1627_v56, %v1204_v13  ;;  %1965 = vmatprep.mubr.msk.f32.mxu1 %vm389_vm2, %v1257_v9 }
 0x45c   : > { %1966 = vmatmul.mubr.msk.f32.gmra.mrb[34].mxu1 %vm389_vm2, %v1258_v11  ;;  %v1260_v17 = vmax.f32 %v1210_v12, 0.0 }
 0x45d   : > { %v1259_v15 = vmax.f32 %v1205_v14, 0.0  ;;  %v1939_v16 = vpop.f32.mrb[40].mxu0 }
 0x45e   : > { %v1220_v18 = vadd.f32 %v1939_v16, %v1627_v56  ;;  %v1214_v19 = vpop.f32.mrb[41].mxu0 }
 0x45f   : > { %v1215_v20 = vadd.f32 %v1627_v56, %v1214_v19  ;;  %1968 = vmatprep.mubr.msk.f32.mxu1 %vm389_vm2, %v1259_v15 }
 0x460   : > { %1969 = vmatmul.mubr.msk.f32.gmra.mrb[36].mxu1 %vm389_vm2, %v1260_v17  ;;  %v1262_v23 = vmax.f32 %v1220_v18, 0.0 }
 0x461   : > { %v1261_v21 = vmax.f32 %v1215_v20, 0.0  ;;  %v1942_v22 = vpop.f32.mrb[42].mxu0 }
 0x462   : > { %v1230_v24 = vadd.f32 %v1942_v22, %v1627_v56  ;;  %v1224_v25 = vpop.f32.mrb[43].mxu0 }
 0x463   : > { %v1225_v26 = vadd.f32 %v1627_v56, %v1224_v25  ;;  %1971 = vmatprep.mubr.msk.f32.mxu1 %vm389_vm2, %v1261_v21 }
 0x464   : > { %1972 = vmatmul.mubr.msk.f32.gmra.mrb[38].mxu1 %vm389_vm2, %v1262_v23  ;;  %v1264_v29 = vmax.f32 %v1230_v24, 0.0 }
 0x465   : > { %v1263_v27 = vmax.f32 %v1225_v26, 0.0  ;;  %v1945_v28 = vpop.f32.mrb[44].mxu0 }
 0x466   : > { %v1240_v30 = vadd.f32 %v1945_v28, %v1627_v56  ;;  %v1234_v31 = vpop.f32.mrb[45].mxu0 }
 0x467   : > { %v1235_v32 = vadd.f32 %v1627_v56, %v1234_v31  ;;  %1974 = vmatprep.mubr.msk.f32.mxu1 %vm389_vm2, %v1263_v27 }
 0x468   : > { %1975 = vmatmul.mubr.msk.f32.gmra.mrb[40].mxu1 %vm389_vm2, %v1264_v29  ;;  %v1266_v35 = vmax.f32 %v1240_v30, 0.0 }
 0x469   : > { %v1265_v33 = vmax.f32 %v1235_v32, 0.0  ;;  %v1948_v34 = vpop.f32.mrb[46].mxu0 }
 0x46a   : > { %v1250_v36 = vadd.f32 %v1948_v34, %v1627_v56  ;;  %v1244_v37 = vpop.f32.mrb[47].mxu0 }
 0x46b   : > { %v1245_v38 = vadd.f32 %v1627_v56, %v1244_v37  ;;  %1977 = vmatprep.mubr.msk.f32.mxu1 %vm389_vm2, %v1265_v33 }
 0x46c   : > { %1978 = vmatmul.mubr.msk.f32.gmra.mrb[42].mxu1 %vm389_vm2, %v1266_v35  ;;  %v1268_v40 = vmax.f32 %v1250_v36, 0.0 }
 0x46d   : > { %v1267_v39 = vmax.f32 %v1245_v38, 0.0 }
 0x46f   : > { %1980 = vmatprep.mubr.msk.f32.mxu1 %vm389_vm2, %v1267_v39 }
 0x470   : > { %1981 = vmatmul.mubr.msk.f32.gmra.mrb[44].mxu1 %vm389_vm2, %v1268_v40 }
 0x527   : > { %v1961_v42 = vpop.f32.mrb[48].mxu0 }
 0x528   : > { %v1402_v43 = vadd.f32 %v1961_v42, %v1645_v41  ;;  %v1396_v44 = vpop.f32.mrb[49].mxu0 }
 0x529   : > { %v1397_v45 = vadd.f32 %v1645_v41, %v1396_v44 }
 0x52a   : > { %1476 = vst [vmem:[%s2303_s4 + $0x8] sm:$0xff] %v1402_v43 }
 0x52b   : > { %1475 = vst [vmem:[%s2303_s4] sm:$0xff] %v1397_v45  ;;  %v1964_v46 = vpop.f32.mrb[32].mxu1 }
 0x52c   : > { %v1412_v47 = vadd.f32 %v1964_v46, %v1645_v41  ;;  %v1406_v48 = vpop.f32.mrb[33].mxu1 }
 0x52d   : > { %v1407_v49 = vadd.f32 %v1645_v41, %v1406_v48 }
 0x52e   : > { %1478 = vst [vmem:[%s2303_s4 + $0x18] sm:$0xff] %v1412_v47 }
 0x52f   : > { %1477 = vst [vmem:[%s2303_s4 + $0x10] sm:$0xff] %v1407_v49  ;;  %v1967_v50 = vpop.f32.mrb[34].mxu1 }
 0x530   : > { %v1422_v51 = vadd.f32 %v1967_v50, %v1645_v41  ;;  %v1416_v52 = vpop.f32.mrb[35].mxu1 }
 0x531   : > { %v1417_v53 = vadd.f32 %v1645_v41, %v1416_v52 }
 0x532   : > { %1480 = vst [vmem:[%s2303_s4 + $0x28] sm:$0xff] %v1422_v51 }
 0x533   : > { %1479 = vst [vmem:[%s2303_s4 + $0x20] sm:$0xff] %v1417_v53  ;;  %v1970_v54 = vpop.f32.mrb[36].mxu1 }
 0x534   : > { %v1432_v55 = vadd.f32 %v1970_v54, %v1645_v41  ;;  %v1426_v56 = vpop.f32.mrb[37].mxu1 }
 0x535   : > { %v1427_v57 = vadd.f32 %v1645_v41, %v1426_v56 }
 0x536   : > { %1482 = vst [vmem:[%s2303_s4 + $0x38] sm:$0xff] %v1432_v55 }
 0x537   : > { %1481 = vst [vmem:[%s2303_s4 + $0x30] sm:$0xff] %v1427_v57  ;;  %v1973_v58 = vpop.f32.mrb[38].mxu1 }
 0x538   : > { %v1442_v59 = vadd.f32 %v1973_v58, %v1645_v41  ;;  %v1436_v60 = vpop.f32.mrb[39].mxu1 }
 0x539   : > { %v1437_v61 = vadd.f32 %v1645_v41, %v1436_v60 }
 0x53a   : > { %1484 = vst [vmem:[%s2303_s4 + $0x48] sm:$0xff] %v1442_v59 }
 0x53b   : > { %1483 = vst [vmem:[%s2303_s4 + $0x40] sm:$0xff] %v1437_v61  ;;  %v1976_v62 = vpop.f32.mrb[40].mxu1 }
 0x53c   : > { %v1452_v63 = vadd.f32 %v1976_v62, %v1645_v41  ;;  %v1446_v0 = vpop.f32.mrb[41].mxu1 }
 0x53d   : > { %v1447_v1 = vadd.f32 %v1645_v41, %v1446_v0 }
 0x53e   : > { %1486 = vst [vmem:[%s2303_s4 + $0x58] sm:$0xff] %v1452_v63 }
 0x53f   : > { %1485 = vst [vmem:[%s2303_s4 + $0x50] sm:$0xff] %v1447_v1  ;;  %v1979_v2 = vpop.f32.mrb[42].mxu1 }
 0x540   : > { %v1462_v3 = vadd.f32 %v1979_v2, %v1645_v41  ;;  %v1456_v4 = vpop.f32.mrb[43].mxu1 }
 0x541   : > { %v1457_v5 = vadd.f32 %v1645_v41, %v1456_v4 }
 0x542   : > { %1488 = vst [vmem:[%s2303_s4 + $0x68] sm:$0xff] %v1462_v3 }
 0x543   : > { %1487 = vst [vmem:[%s2303_s4 + $0x60] sm:$0xff] %v1457_v5  ;;  %v1982_v6 = vpop.f32.mrb[44].mxu1 }
 0x544   : > { %v1472_v7 = vadd.f32 %v1982_v6, %v1645_v41  ;;  %v1466_v8 = vpop.f32.mrb[45].mxu1 }
 0x545   : > { %v1467_v9 = vadd.f32 %v1645_v41, %v1466_v8 }
 0x546   : > { %1490 = vst [vmem:[%s2303_s4 + $0x78] sm:$0xff] %v1472_v7 }
 0x547   : > { %1489 = vst [vmem:[%s2303_s4 + $0x70] sm:$0xff] %v1467_v9 }
 0x548 PF: > { %s12_s9 = sadd.s32 1, %s2043_s9  }
 0x549   : > { %p9_p4 = scmp.ge.s32.totalorder %s12_s9, 4  }
 0x54b   :  { %11 = sbr.rel (!%p9_p4) target bundleno = 1 (0x1), region = 58 }

</bundles_post_ra>
